<compile_context>
chip_gen: v6e
topology: v6e:2x2x1
jax: 0.10.0
libtpu: 0.0.40
codegen_flags: <defaults>
</compile_context>

<pallas_src>
import jax
import jax.numpy as jnp
from jax.experimental import pallas as pl
from jax.experimental.pallas import tpu as pltpu

H1 = 128          # hidden width of layer 1 (fixed by the PyTorch module)
H2 = 256          # hidden width of layer 2 (fixed by the PyTorch module)
LANE = 128        # TPU lane width


def _round_up(x, m):
    return (x + m - 1) // m * m


def dqn_mlp_kernel(x_ref, w1_ref, w2_ref, w3_ref, b_ref, o_ref):
    """One batch tile: x (TB, in_dim) f32 -> q (TB, out_pad) f32."""
    w1 = w1_ref[...]
    cdt = w1.dtype                      # compute dtype for MXU inputs (bf16)

    # Layer 1: Linear(in_dim, 128) + ReLU   (bf16 MXU inputs, f32 accumulate)
    h1 = jnp.dot(x_ref[...].astype(cdt), w1, preferred_element_type=jnp.float32)
    h1 = jnp.maximum(h1 + b_ref[:, 0:H1], 0.0)

    # Layer 2: Linear(128, 256) + ReLU
    h2 = jnp.dot(h1.astype(cdt), w2_ref[...], preferred_element_type=jnp.float32)
    h2 = jnp.maximum(h2 + b_ref[:, H1:H1 + H2], 0.0)

    # Layer 3: Linear(256, out_pad), no activation (Q-values)
    q = jnp.dot(h2.astype(cdt), w3_ref[...], preferred_element_type=jnp.float32)
    q = q + b_ref[:, H1 + H2:]

    o_ref[...] = q.astype(o_ref.dtype)


def dqn_forward(x, params, output_dim, *, tile_b=256):
    """x: (B, input_dim) float32. Returns (B, output_dim) float32 Q-values.

    tile_b: batch tile (multiple of 8; 256 matches the v6e/v7x MXU height,
    128 is enough on v5e). Batch is zero-padded up to a multiple of tile_b.
    """
    w1, w2, w3, b = params["w1"], params["w2"], params["w3"], params["b"]
    B, in_dim = x.shape
    out_pad = w3.shape[1]               # lane-padded output width (>=128)

    nb = (B + tile_b - 1) // tile_b
    Bp = nb * tile_b
    if Bp != B:
        x = jnp.pad(x, ((0, Bp - B), (0, 0)))

    # Weights / packed bias: constant block index -> VMEM-resident across steps.
    const = lambda shape: pl.BlockSpec(shape, lambda i: (0, 0))

    out = pl.pallas_call(
        dqn_mlp_kernel,
        out_shape=jax.ShapeDtypeStruct((Bp, out_pad), jnp.float32),
        grid=(nb,),
        in_specs=[
            pl.BlockSpec((tile_b, in_dim), lambda i: (i, 0)),   # x streams
            const(w1.shape),
            const(w2.shape),
            const(w3.shape),
            const(b.shape),
        ],
        out_specs=pl.BlockSpec((tile_b, out_pad), lambda i: (i, 0)),
        compiler_params=pltpu.CompilerParams(
            dimension_semantics=("parallel",),   # shard batch tiles across TCs (v7x)
        ),
    )(x, w1, w2, w3, b)

    return out[:B, :output_dim]


def init_dqn_params(key, input_dim, output_dim, *, use_bf16=True):
    """PyTorch nn.Linear default init: U(-1/sqrt(fan_in), 1/sqrt(fan_in)).

    Weights stored as (in, out) in bf16 (MXU inputs); biases packed into one
    f32 buffer of shape (1, 128 + 256 + out_pad). Layer-3 weight/bias are
    zero-padded on the output axis to a multiple of 128 lanes.
    """
    wdt = jnp.bfloat16 if use_bf16 else jnp.float32
    out_pad = _round_up(max(output_dim, 1), LANE)

    def linear_init(k, fan_in, fan_out):
        kw, kb = jax.random.split(k)
        bound = 1.0 / (float(fan_in) ** 0.5)
        w = jax.random.uniform(kw, (fan_in, fan_out), jnp.float32, -bound, bound)
        b = jax.random.uniform(kb, (fan_out,), jnp.float32, -bound, bound)
        return w, b

    k1, k2, k3 = jax.random.split(key, 3)
    w1, b1 = linear_init(k1, input_dim, H1)
    w2, b2 = linear_init(k2, H1, H2)
    w3, b3 = linear_init(k3, H2, output_dim)

    # Lane-pad layer 3 to out_pad columns (extra lanes are exactly zero and
    # get sliced off in the wrapper).
    w3p = jnp.zeros((H2, out_pad), jnp.float32).at[:, :output_dim].set(w3)
    b3p = jnp.zeros((out_pad,), jnp.float32).at[:output_dim].set(b3)

    b_packed = jnp.concatenate([b1, b2, b3p]).reshape(1, -1)  # (1, 384+out_pad) f32

    return {
        "w1": w1.astype(wdt),
        "w2": w2.astype(wdt),
        "w3": w3p.astype(wdt),
        "b": b_packed,
    }


def dqn_forward_ref(x, params, output_dim):
    """Pure-JAX reference with the same bf16 MXU-input rounding + f32 accumulation."""
    f32 = jnp.float32
    cdt = params["w1"].dtype
    w1 = params["w1"].astype(f32)
    w2 = params["w2"].astype(f32)
    w3 = params["w3"].astype(f32)
    b = params["b"].astype(f32)
    h1 = jnp.maximum(x.astype(cdt).astype(f32) @ w1 + b[:, :H1], 0.0)
    h2 = jnp.maximum(h1.astype(cdt).astype(f32) @ w2 + b[:, H1:H1 + H2], 0.0)
    q = h2.astype(cdt).astype(f32) @ w3 + b[:, H1 + H2:]
    return q[:, :output_dim]


if __name__ == "__main__":
    key = jax.random.PRNGKey(0)
    k_params, k_x = jax.random.split(key)

    batch = 2         # e.g. a couple of CartPole states
    input_dim = 4     # CartPole observation dim
    output_dim = 2    # CartPole action dim

    params = init_dqn_params(k_params, input_dim, output_dim)
    x = jax.random.normal(k_x, (batch, input_dim), jnp.float32)

    q = jax.block_until_ready(dqn_forward(x, params, output_dim))
    q_ref = dqn_forward_ref(x, params, output_dim)

    assert q.shape == (batch, output_dim), q.shape
    assert jnp.allclose(q, q_ref, atol=1e-2, rtol=1e-2), (q, q_ref)

    print("KERNEL_OK")
</pallas_src>

<mosaic_0001>
module attributes {stable_mosaic.version = 11 : i64} {
  func.func @dqn_mlp_kernel(%arg0: i32, %arg1: memref<256x4xf32, #tpu.memory_space<vmem>>, %arg2: memref<4x128xbf16, #tpu.memory_space<vmem>>, %arg3: memref<128x256xbf16, #tpu.memory_space<vmem>>, %arg4: memref<256x128xbf16, #tpu.memory_space<vmem>>, %arg5: memref<1x512xf32, #tpu.memory_space<vmem>>, %arg6: memref<256x128xf32, #tpu.memory_space<vmem>>) attributes {dimension_semantics = [#tpu.dimension_semantics<parallel>], iteration_bounds = array<i64: 1>, scalar_prefetch = 0 : i64, scratch_operands = 0 : i64, tpu.core_type = #tpu.core_type<tc>, window_params = [{transform_indices = @transform_0, window_bounds = array<i64: 256, 4>}, {pipeline_mode = #tpu.pipeline_mode<synchronous>, transform_indices = @transform_1, window_bounds = array<i64: 4, 128>}, {pipeline_mode = #tpu.pipeline_mode<synchronous>, transform_indices = @transform_2, window_bounds = array<i64: 128, 256>}, {pipeline_mode = #tpu.pipeline_mode<synchronous>, transform_indices = @transform_3, window_bounds = array<i64: 256, 128>}, {pipeline_mode = #tpu.pipeline_mode<synchronous>, transform_indices = @transform_4, window_bounds = array<i64: 1, 512>}, {transform_indices = @transform_5, window_bounds = array<i64: 256, 128>}]} {
    %c0 = arith.constant 0 : index
    %c0_0 = arith.constant 0 : index
    %0 = vector.load %arg2[%c0, %c0_0] : memref<4x128xbf16, #tpu.memory_space<vmem>>, vector<4x128xbf16>
    %c0_1 = arith.constant 0 : index
    %c0_2 = arith.constant 0 : index
    %1 = vector.load %arg1[%c0_1, %c0_2] : memref<256x4xf32, #tpu.memory_space<vmem>>, vector<256x4xf32>
    %2 = arith.truncf %1 : vector<256x4xf32> to vector<256x4xbf16>
    %cst = arith.constant dense<0.000000e+00> : vector<256x128xf32>
    %3 = tpu.matmul %2, %0, %cst {dimension_numbers = #tpu.dot_dimension_numbers<[1], [0], [0], [1], [0, 0, 1, 1], [], []>} : vector<256x4xbf16>, vector<4x128xbf16>, vector<256x128xf32> -> vector<256x128xf32>
    %c0_3 = arith.constant 0 : index
    %c0_4 = arith.constant 0 : index
    %4 = vector.load %arg5[%c0_3, %c0_4] : memref<1x512xf32, #tpu.memory_space<vmem>>, vector<1x128xf32>
    %5 = vector.broadcast %4 : vector<1x128xf32> to vector<256x128xf32>
    %6 = arith.addf %3, %5 : vector<256x128xf32>
    %cst_5 = arith.constant 0.000000e+00 : f32
    %7 = vector.broadcast %cst_5 : f32 to vector<256x128xf32>
    %8 = arith.maximumf %6, %7 : vector<256x128xf32>
    %9 = arith.truncf %8 : vector<256x128xf32> to vector<256x128xbf16>
    %c0_6 = arith.constant 0 : index
    %c0_7 = arith.constant 0 : index
    %10 = vector.load %arg3[%c0_6, %c0_7] : memref<128x256xbf16, #tpu.memory_space<vmem>>, vector<128x256xbf16>
    %cst_8 = arith.constant dense<0.000000e+00> : vector<256x256xf32>
    %11 = tpu.matmul %9, %10, %cst_8 {dimension_numbers = #tpu.dot_dimension_numbers<[1], [0], [0], [1], [0, 0, 1, 1], [], []>} : vector<256x128xbf16>, vector<128x256xbf16>, vector<256x256xf32> -> vector<256x256xf32>
    %c0_9 = arith.constant 0 : index
    %c128 = arith.constant 128 : index
    %12 = vector.load %arg5[%c0_9, %c128] : memref<1x512xf32, #tpu.memory_space<vmem>>, vector<1x256xf32>
    %13 = vector.broadcast %12 : vector<1x256xf32> to vector<256x256xf32>
    %14 = arith.addf %11, %13 : vector<256x256xf32>
    %cst_10 = arith.constant 0.000000e+00 : f32
    %15 = vector.broadcast %cst_10 : f32 to vector<256x256xf32>
    %16 = arith.maximumf %14, %15 : vector<256x256xf32>
    %17 = arith.truncf %16 : vector<256x256xf32> to vector<256x256xbf16>
    %c0_11 = arith.constant 0 : index
    %c0_12 = arith.constant 0 : index
    %18 = vector.load %arg4[%c0_11, %c0_12] : memref<256x128xbf16, #tpu.memory_space<vmem>>, vector<256x128xbf16>
    %cst_13 = arith.constant dense<0.000000e+00> : vector<256x128xf32>
    %19 = tpu.matmul %17, %18, %cst_13 {dimension_numbers = #tpu.dot_dimension_numbers<[1], [0], [0], [1], [0, 0, 1, 1], [], []>} : vector<256x256xbf16>, vector<256x128xbf16>, vector<256x128xf32> -> vector<256x128xf32>
    %c0_14 = arith.constant 0 : index
    %c384 = arith.constant 384 : index
    %20 = vector.load %arg5[%c0_14, %c384] : memref<1x512xf32, #tpu.memory_space<vmem>>, vector<1x128xf32>
    %21 = vector.broadcast %20 : vector<1x128xf32> to vector<256x128xf32>
    %22 = arith.addf %19, %21 : vector<256x128xf32>
    %c0_15 = arith.constant 0 : index
    %c0_16 = arith.constant 0 : index
    %23 = vector.load %arg6[%c0_15, %c0_16] : memref<256x128xf32, #tpu.memory_space<vmem>>, vector<256x128xf32>
    tpu.vector_store %arg6[%c0_15, %c0_16], %22 {strides = array<i32>} : memref<256x128xf32, #tpu.memory_space<vmem>>, vector<256x128xf32>,
    return
  }
  func.func @transform_0(%arg0: i32) -> (i32, i32) {
    %c0_i32 = arith.constant 0 : i32
    %c0_i32_0 = arith.constant 0 : i32
    return %arg0, %c0_i32 : i32, i32
  }
  func.func @transform_1(%arg0: i32) -> (i32, i32) {
    %c0_i32 = arith.constant 0 : i32
    %c0_i32_0 = arith.constant 0 : i32
    %c0_i32_1 = arith.constant 0 : i32
    return %c0_i32, %c0_i32_0 : i32, i32
  }
  func.func @transform_2(%arg0: i32) -> (i32, i32) {
    %c0_i32 = arith.constant 0 : i32
    %c0_i32_0 = arith.constant 0 : i32
    %c0_i32_1 = arith.constant 0 : i32
    return %c0_i32, %c0_i32_0 : i32, i32
  }
  func.func @transform_3(%arg0: i32) -> (i32, i32) {
    %c0_i32 = arith.constant 0 : i32
    %c0_i32_0 = arith.constant 0 : i32
    %c0_i32_1 = arith.constant 0 : i32
    return %c0_i32, %c0_i32_0 : i32, i32
  }
  func.func @transform_4(%arg0: i32) -> (i32, i32) {
    %c0_i32 = arith.constant 0 : i32
    %c0_i32_0 = arith.constant 0 : i32
    %c0_i32_1 = arith.constant 0 : i32
    return %c0_i32, %c0_i32_0 : i32, i32
  }
  func.func @transform_5(%arg0: i32) -> (i32, i32) {
    %c0_i32 = arith.constant 0 : i32
    %c0_i32_0 = arith.constant 0 : i32
    return %arg0, %c0_i32 : i32, i32
  }
}

</mosaic_0001>

<bundles_post_ra>
// kernel: tpu_custom_call.1
= control target key start
LH: loop header
LB: loop body
LE: loop exit
PB: predicated region body
PF: predicated region fallthrough
CT: control target
= control target key end

     0   :  { %vm127_vm0 = vcmask 1041408   ;;  %vm78_vm1 = vcmask 31744   ;;  %s1773_s0 = inlined_call_operand.vmem [shape: f32[256,4], index: 0, kind: input, shape index: {}]   ;;  %s1774_s1 = inlined_call_operand.vmem [shape: bf16[4,128], index: 1, kind: input, shape index: {}]   ;;  %s1775_s2 = inlined_call_operand.vmem [shape: bf16[128,256], index: 2, kind: input, shape index: {}]   ;;  %s1776_s3 = inlined_call_operand.vmem [shape: bf16[256,128], index: 3, kind: input, shape index: {}]   ;;  %s1777_s4 = inlined_call_operand.vmem [shape: f32[1,512], index: 4, kind: input, shape index: {}]   ;;  %s1778_s5 = inlined_call_operand.hbm [shape: f32[256,128], index: 5, kind: output, shape index: {}]  }
   0x1   :  { %v22_v0 = vld [vmem:[%s1774_s1] sm:$0x3]  ;;  %v24_v2 = vld [vmem:[%s1773_s0 + $0x8] sm:$0xff]  ;;  %v25_v5 = vld [vmem:[%s1773_s0 + $0x10] sm:$0xff] }
   0x2   :  { %v23_v1 = vld [vmem:[%s1773_s0] sm:$0xff]  ;;  %1296 = vmatprep.subr.msk.bf16.mxu0 %vm127_vm0, %v22_v0  ;;  %v129_v3 = vsel %vm127_vm0, %v22_v0, 0  ;;  %v26_v6 = vld [vmem:[%s1773_s0 + $0x18] sm:$0xff]  ;;  %1297 = vmatprep.subr.msk.bf16.mxu1 %vm127_vm0, %v22_v0  ;;  %v28_v9 = vld [vmem:[%s1773_s0 + $0x28] sm:$0xff] }
   0x3   :  { %v55_v4 = vpack.c.bf16 %v24_v2, %v23_v1  ;;  %v27_v7 = vld [vmem:[%s1773_s0 + $0x20] sm:$0xff]  ;;  %1261 = vmatpush3.bf16.msra.mxu0 %v129_v3  ;;  %v56_v8 = vpack.c.bf16 %v26_v6, %v25_v5  ;;  %1295 = vmatpush3.bf16.msra.mxu1 %v129_v3  ;;  %v29_v11 = vld [vmem:[%s1773_s0 + $0x30] sm:$0xff]  ;;  %v30_v12 = vld [vmem:[%s1773_s0 + $0x38] sm:$0xff] }
   0x4   :  { %v57_v10 = vpack.c.bf16 %v28_v9, %v27_v7  ;;  %v31_v13 = vld [vmem:[%s1773_s0 + $0x40] sm:$0xff]  ;;  %v40_v15 = vld [vmem:[%s1773_s0 + $0x88] sm:$0xff]  ;;  %v41_v16 = vld [vmem:[%s1773_s0 + $0x90] sm:$0xff]  ;;  %v58_v24 = vpack.c.bf16 %v30_v12, %v29_v11 }
   0x5   :  { %1262 = vmatprep.mubr.msk.bf16.mxu0 %vm78_vm1, %v55_v4  ;;  %v39_v14 = vld [vmem:[%s1773_s0 + $0x80] sm:$0xff]  ;;  %v42_v17 = vld [vmem:[%s1773_s0 + $0x98] sm:$0xff]  ;;  %v32_v18 = vld [vmem:[%s1773_s0 + $0x48] sm:$0xff] }
   0x6   :  { %1263 = vmatmul.mubr.msk.bf16.vlgmr.msra.gmra.mxu0 %vm78_vm1, %v56_v8  ;;  %v63_v19 = vpack.c.bf16 %v40_v15, %v39_v14  ;;  %v64_v20 = vpack.c.bf16 %v42_v17, %v41_v16  ;;  %v43_v21 = vld [vmem:[%s1773_s0 + $0xa0] sm:$0xff]  ;;  %v44_v22 = vld [vmem:[%s1773_s0 + $0xa8] sm:$0xff]  ;;  %v45_v25 = vld [vmem:[%s1773_s0 + $0xb0] sm:$0xff]  ;;  %v59_v26 = vpack.c.bf16 %v32_v18, %v31_v13 }
   0x7   :  { %1266 = vmatprep.mubr.msk.bf16.mxu0 %vm78_vm1, %v57_v10  ;;  %v65_v23 = vpack.c.bf16 %v44_v22, %v43_v21  ;;  %v46_v27 = vld [vmem:[%s1773_s0 + $0xb8] sm:$0xff]  ;;  %v47_v28 = vld [vmem:[%s1773_s0 + $0xc0] sm:$0xff]  ;;  %v48_v29 = vld [vmem:[%s1773_s0 + $0xc8] sm:$0xff] }
   0x8   :  { %1278 = vmatprep.mubr.msk.bf16.mxu1 %vm78_vm1, %v63_v19  ;;  %v1302_v30 = vld [vmem:[%s1775_s2 + $0x70] ss:$8 sps:$4 sm:$0xff]   ;;  %v1304_v32 = vld [vmem:[%s1775_s2 + $0x74] ss:$8 sps:$4 sm:$0xff]   ;;  %v1307_v34 = vld [vmem:[%s1775_s2 + $0x64] ss:$8 sps:$4 sm:$0xff]   ;;  %v66_v37 = vpack.c.bf16 %v46_v27, %v45_v25  ;;  %v67_v38 = vpack.c.bf16 %v48_v29, %v47_v28 }
   0x9   :  { %1279 = vmatmul.mubr.msk.bf16.vlgmr.msra.gmra.mxu1 %vm78_vm1, %v64_v20  ;;  %v33_v31 = vld [vmem:[%s1773_s0 + $0x50] sm:$0xff]  ;;  %v34_v33 = vld [vmem:[%s1773_s0 + $0x58] sm:$0xff]  ;;  %v35_v35 = vld [vmem:[%s1773_s0 + $0x60] sm:$0xff]  ;;  %448 = vmatprep.subr.bf16.mxu1 %v1304_v32 }
   0xa   :  { %1282 = vmatprep.mubr.msk.bf16.mxu1 %vm78_vm1, %v65_v23  ;;  %v36_v36 = vld [vmem:[%s1773_s0 + $0x68] sm:$0xff]  ;;  %449 = vmatpush1.bf16.msra.mxu1 %v1302_v30  ;;  %v1310_v40 = vld [vmem:[%s1775_s2 + $0x54] ss:$8 sps:$4 sm:$0xff]   ;;  %v60_v41 = vpack.c.bf16 %v34_v33, %v33_v31  ;;  %v1308_v44 = vld [vmem:[%s1775_s2 + $0x50] ss:$8 sps:$4 sm:$0xff]  }
   0xb   :  { %v1305_v39 = vld [vmem:[%s1775_s2 + $0x60] ss:$8 sps:$4 sm:$0xff]   ;;  %450 = vmatprep.subr.bf16.mxu1 %v1307_v34  ;;  %v49_v42 = vld [vmem:[%s1773_s0 + $0xd0] sm:$0xff]  ;;  %v50_v43 = vld [vmem:[%s1773_s0 + $0xd8] sm:$0xff]  ;;  %v61_v45 = vpack.c.bf16 %v36_v36, %v35_v35 }
   0xc   :  { %v51_v46 = vld [vmem:[%s1773_s0 + $0xe0] sm:$0xff]  ;;  %v52_v47 = vld [vmem:[%s1773_s0 + $0xe8] sm:$0xff]  ;;  %v37_v49 = vld [vmem:[%s1773_s0 + $0x70] sm:$0xff]  ;;  %v68_v52 = vpack.c.bf16 %v50_v43, %v49_v42 }
   0xd   :  { %v1313_v48 = vld [vmem:[%s1775_s2 + $0x44] ss:$8 sps:$4 sm:$0xff]   ;;  %v38_v50 = vld [vmem:[%s1773_s0 + $0x78] sm:$0xff]  ;;  %v1311_v51 = vld [vmem:[%s1775_s2 + $0x40] ss:$8 sps:$4 sm:$0xff]   ;;  %v69_v54 = vpack.c.bf16 %v52_v47, %v51_v46 }
   0xe   :  { %1267 = vmatmul.mubr.msk.bf16.gmra.mxu0 %vm78_vm1, %v58_v24  ;;  %451 = vmatpush1.bf16.msra.mxu1 %v1305_v39  ;;  %v1316_v53 = vld [vmem:[%s1775_s2 + $0x34] ss:$8 sps:$4 sm:$0xff]   ;;  %v62_v55 = vpack.c.bf16 %v38_v50, %v37_v49  ;;  %v1314_v58 = vld [vmem:[%s1775_s2 + $0x30] ss:$8 sps:$4 sm:$0xff]  }
   0xf   :  { %1270 = vmatprep.mubr.msk.bf16.mxu0 %vm78_vm1, %v59_v26  ;;  %452 = vmatprep.subr.bf16.mxu1 %v1310_v40  ;;  %v53_v56 = vld [vmem:[%s1773_s0 + $0xf0] sm:$0xff]  ;;  %v54_v57 = vld [vmem:[%s1773_s0 + $0xf8] sm:$0xff] }
  0x10   :  { %v70_v59 = vpack.c.bf16 %v54_v57, %v53_v56 }
  0x11   :  { %1283 = vmatmul.mubr.msk.bf16.gmra.mxu1 %vm78_vm1, %v66_v37 }
  0x12   :  { %1286 = vmatprep.mubr.msk.bf16.mxu1 %vm78_vm1, %v67_v38  ;;  %453 = vmatpush1.bf16.msra.mxu1 %v1308_v44 }
  0x13   :  { %454 = vmatprep.subr.bf16.mxu1 %v1313_v48 }
  0x16   :  { %1271 = vmatmul.mubr.msk.bf16.gmra.mxu0 %vm78_vm1, %v60_v41  ;;  %455 = vmatpush1.bf16.msra.mxu1 %v1311_v51 }
  0x17   :  { %1274 = vmatprep.mubr.msk.bf16.mxu0 %vm78_vm1, %v61_v45  ;;  %456 = vmatprep.subr.bf16.mxu1 %v1316_v53 }
  0x19   :  { %1287 = vmatmul.mubr.msk.bf16.gmra.mxu1 %vm78_vm1, %v68_v52 }
  0x1a   :  { %1290 = vmatprep.mubr.msk.bf16.mxu1 %vm78_vm1, %v69_v54 }
  0x1e   :  { %1275 = vmatmul.mubr.msk.bf16.gmra.mxu0 %vm78_vm1, %v62_v55 }
  0x1f   :  { %10 = vsyncpa [#allocation3], 0  ;;  %457 = vmatpush1.bf16.msra.mxu1 %v1314_v58  ;;  %v1319_v60 = vld [vmem:[%s1775_s2 + $0x24] ss:$8 sps:$4 sm:$0xff]   ;;  %v1317_v61 = vld [vmem:[%s1775_s2 + $0x20] ss:$8 sps:$4 sm:$0xff]  }
  0x20   :  { %458 = vmatprep.subr.bf16.mxu1 %v1319_v60  ;;  %v1322_v62 = vld [vmem:[%s1775_s2 + $0x14] ss:$8 sps:$4 sm:$0xff]   ;;  %v1320_v63 = vld [vmem:[%s1775_s2 + $0x10] ss:$8 sps:$4 sm:$0xff]   ;;  %v1325_v0 = vld [vmem:[%s1775_s2 + $0x4] ss:$8 sps:$4 sm:$0xff]  }
  0x21   :  { %1291 = vmatmul.mubr.msk.bf16.gmra.mxu1 %vm78_vm1, %v70_v59  ;;  %v1323_v1 = vld [vmem:[%s1775_s2] ss:$8 sps:$4 sm:$0xff]   ;;  %v1364_v2 = vmov 0   ;;  %v1326_v8 = vld [vmem:[%s1776_s3 + $0x78] sm:$0xff]   ;;  %v1328_v10 = vld [vmem:[%s1776_s3 + $0x70] sm:$0xff]  }
  0x22   :  { %480 = vmatprep.mubr.bf16.mxu1 %v1364_v2  ;;  %v1565_v5 = vld [vmem:[%s1777_s4] ss:$0 sm:$0xff]  ;;  %v1327_v9 = vld [vmem:[%s1776_s3 + $0x38] sm:$0xff]   ;;  %1148 = vmatprep.subr.bf16.mxu0 %v1326_v8  ;;  %v1329_v14 = vld [vmem:[%s1776_s3 + $0x30] sm:$0xff]  }
  0x23   :  { %459 = vmatpush1.bf16.msra.mxu1 %v1317_v61  ;;  %1149 = vmatpush3.bf16.msra.mxu0 %v1327_v9  ;;  %v1330_v17 = vld [vmem:[%s1776_s3 + $0x68] sm:$0xff]   ;;  %v1332_v24 = vld [vmem:[%s1776_s3 + $0x60] sm:$0xff]   ;;  %v1334_v29 = vld [vmem:[%s1776_s3 + $0x58] sm:$0xff]  }
  0x24   :  { %460 = vmatprep.subr.bf16.mxu1 %v1322_v62  ;;  %1150 = vmatprep.subr.bf16.mxu0 %v1328_v10  ;;  %v1331_v22 = vld [vmem:[%s1776_s3 + $0x28] sm:$0xff]   ;;  %v1333_v27 = vld [vmem:[%s1776_s3 + $0x20] sm:$0xff]   ;;  %v1335_v34 = vld [vmem:[%s1776_s3 + $0x18] sm:$0xff]  }
  0x27   :  { %461 = vmatpush1.bf16.msra.mxu1 %v1320_v63  ;;  %1151 = vmatpush3.bf16.msra.mxu0 %v1329_v14 }
  0x28   :  { %462 = vmatprep.subr.bf16.mxu1 %v1325_v0  ;;  %1152 = vmatprep.subr.bf16.mxu0 %v1330_v17 }
  0x2b   :  { %463 = vmatpush1.bf16.msra.mxu1 %v1323_v1  ;;  %1153 = vmatpush3.bf16.msra.mxu0 %v1331_v22  ;;  %v1336_v22 = vld [vmem:[%s1776_s3 + $0x50] sm:$0xff]  }
  0x2c   :  { %1154 = vmatprep.subr.bf16.mxu0 %v1332_v24 }
  0x2f   :  { %1155 = vmatpush3.bf16.msra.mxu0 %v1333_v27  ;;  %v1338_v27 = vld [vmem:[%s1776_s3 + $0x48] sm:$0xff]  }
  0x30   :  { %1156 = vmatprep.subr.bf16.mxu0 %v1334_v29 }
  0x33   :  { %1157 = vmatpush3.bf16.msra.mxu0 %v1335_v34  ;;  %v1341_v34 = vld [vmem:[%s1776_s3] sm:$0xff]  }
  0x34   :  { %1158 = vmatprep.subr.bf16.mxu0 %v1336_v22 }
  0xc6   :  { %v1264_v3 = vpop.f32.mrf.mxu0 }
  0xc7   :  { %v174_v23 = vadd.f32 %v1264_v3, %v1565_v5 }
  0xc8   :  { %v165_v4 = vpop.f32.mrf.mxu0 }
  0xc9   :  { %v166_v7 = vadd.f32 %v1565_v5, %v165_v4  ;;  %v294_v28 = vmax.f32 %v174_v23, 0.0  ;;  %v1280_v62 = vpop.f32.mrf.mxu1  ;;  %v1337_v23 = vld [vmem:[%s1776_s3 + $0x10] sm:$0xff]  }
  0xca   :  { %v1265_v6 = vpop.f32.mrf.mxu0  ;;  %1159 = vmatpush3.bf16.msra.mxu0 %v1337_v23 }
  0xcb   :  { %v292_v15 = vmax.f32 %v166_v7, 0.0  ;;  %v177_v19 = vadd.f32 %v1265_v6, %v1565_v5  ;;  %v229_v1 = vpop.f32.mrf.mxu1  ;;  %1160 = vmatprep.subr.bf16.mxu0 %v1338_v27 }
  0xcc   :  { %v168_v11 = vpop.f32.mrf.mxu0 }
  0xcd   :  { %v169_v12 = vadd.f32 %v1565_v5, %v168_v11  ;;  %v295_v25 = vmax.f32 %v177_v19, 0.0  ;;  %v1281_v7 = vpop.f32.mrf.mxu1 }
  0xce   :  { %v1268_v13 = vpop.f32.mrf.mxu0  ;;  %v241_v19 = vadd.f32 %v1281_v7, %v1565_v5 }
  0xcf   :  { %v293_v16 = vmax.f32 %v169_v12, 0.0  ;;  %v325_v30 = vpack.c.bf16 %v295_v25, %v294_v28  ;;  %v190_v38 = vadd.f32 %v1268_v13, %v1565_v5  ;;  %v232_v10 = vpop.f32.mrf.mxu1  ;;  %v230_v12 = vadd.f32 %v1565_v5, %v229_v1  ;;  %v1339_v28 = vld [vmem:[%s1776_s3 + $0x8] sm:$0xff]  }
  0xd0   :  { %v181_v18 = vpop.f32.mrf.mxu0  ;;  %v233_v13 = vadd.f32 %v1565_v5, %v232_v10  ;;  %v311_v25 = vmax.f32 %v241_v19, 0.0  ;;  %1161 = vmatpush3.bf16.msra.mxu0 %v1339_v28 }
  0xd1   :  { %v324_v20 = vpack.c.bf16 %v293_v16, %v292_v15  ;;  %v182_v31 = vadd.f32 %v1565_v5, %v181_v18  ;;  %v298_v42 = vmax.f32 %v190_v38, 0.0  ;;  %v1284_v14 = vpop.f32.mrf.mxu1  ;;  %v308_v15 = vmax.f32 %v230_v12, 0.0  ;;  %v356_v12 = vld [vmem:[%s1777_s4 + $0x1] sm:$0x3] }
  0xd2   :  { %v1269_v21 = vpop.f32.mrf.mxu0  ;;  %v309_v16 = vmax.f32 %v233_v13, 0.0  ;;  %v238_v18 = vadd.f32 %v1280_v62, %v1565_v5  ;;  %v254_v38 = vadd.f32 %v1284_v14, %v1565_v5 }
  0xd3   :  { %481 = vmatmul.mubr.bf16.vlgmr.msra.gmra.mxu1 %v324_v20  ;;  %v296_v35 = vmax.f32 %v182_v31, 0.0  ;;  %v193_v39 = vadd.f32 %v1269_v21, %v1565_v5  ;;  %v245_v17 = vpop.f32.mrf.mxu1 }
  0xd4   :  { %490 = vmatprep.mubr.bf16.mxu1 %v1364_v2  ;;  %v184_v26 = vpop.f32.mrf.mxu0  ;;  %v332_v20 = vpack.c.bf16 %v309_v16, %v308_v15  ;;  %v310_v24 = vmax.f32 %v238_v18, 0.0 }
  0xd5   :  { %v185_v32 = vadd.f32 %v1565_v5, %v184_v26  ;;  %v299_v43 = vmax.f32 %v193_v39, 0.0  ;;  %v1285_v21 = vpop.f32.mrf.mxu1 }
  0xd6   :  { %v1272_v33 = vpop.f32.mrf.mxu0  ;;  %v333_v29 = vpack.c.bf16 %v311_v25, %v310_v24  ;;  %v257_v39 = vadd.f32 %v1285_v21, %v1565_v5 }
  0xd7   :  { %v297_v36 = vmax.f32 %v185_v32, 0.0  ;;  %v327_v45 = vpack.c.bf16 %v299_v43, %v298_v42  ;;  %v206_v52 = vadd.f32 %v1272_v33, %v1565_v5  ;;  %v248_v26 = vpop.f32.mrf.mxu1  ;;  %v1340_v33 = vld [vmem:[%s1776_s3 + $0x40] sm:$0xff]   ;;  %v314_v42 = vmax.f32 %v254_v38, 0.0 }
  0xd8   :  { %v197_v37 = vpop.f32.mrf.mxu0  ;;  %v249_v31 = vadd.f32 %v1565_v5, %v248_v26  ;;  %1162 = vmatprep.subr.bf16.mxu0 %v1340_v33  ;;  %v315_v43 = vmax.f32 %v257_v39, 0.0 }
  0xd9   :  { %v326_v40 = vpack.c.bf16 %v297_v36, %v296_v35  ;;  %v198_v46 = vadd.f32 %v1565_v5, %v197_v37  ;;  %v302_v56 = vmax.f32 %v206_v52, 0.0  ;;  %v1288_v32 = vpop.f32.mrf.mxu1  ;;  %1163 = vmatpush3.bf16.msra.mxu0 %v1341_v34 }
  0xda   :  { %v1273_v41 = vpop.f32.mrf.mxu0  ;;  %v313_v36 = vmax.f32 %v249_v31, 0.0  ;;  %v270_v52 = vadd.f32 %v1288_v32, %v1565_v5 }
  0xdb   :  { %491 = vmatmul.mubr.bf16.gmra.mxu1 %v325_v30  ;;  %v300_v49 = vmax.f32 %v198_v46, 0.0  ;;  %v209_v53 = vadd.f32 %v1273_v41, %v1565_v5  ;;  %v246_v30 = vadd.f32 %v1565_v5, %v245_v17  ;;  %v261_v37 = vpop.f32.mrf.mxu1 }
  0xdc   :  { %500 = vmatprep.mubr.bf16.mxu1 %v1364_v2  ;;  %v200_v44 = vpop.f32.mrf.mxu0  ;;  %v262_v46 = vadd.f32 %v1565_v5, %v261_v37 }
  0xdd   :  { %v201_v47 = vadd.f32 %v1565_v5, %v200_v44  ;;  %v303_v57 = vmax.f32 %v209_v53, 0.0  ;;  %v312_v35 = vmax.f32 %v246_v30, 0.0  ;;  %v1289_v41 = vpop.f32.mrf.mxu1 }
  0xde   :  { %v1276_v48 = vpop.f32.mrf.mxu0  ;;  %v273_v53 = vadd.f32 %v1289_v41, %v1565_v5 }
  0xdf   :  { %v301_v50 = vmax.f32 %v201_v47, 0.0  ;;  %v329_v59 = vpack.c.bf16 %v303_v57, %v302_v56  ;;  %v222_v3 = vadd.f32 %v1276_v48, %v1565_v5  ;;  %v264_v44 = vpop.f32.mrf.mxu1  ;;  %v318_v56 = vmax.f32 %v270_v52, 0.0 }
  0xe0   :  { %v213_v51 = vpop.f32.mrf.mxu0  ;;  %v265_v47 = vadd.f32 %v1565_v5, %v264_v44  ;;  %v319_v57 = vmax.f32 %v273_v53, 0.0 }
  0xe1   :  { %v328_v54 = vpack.c.bf16 %v301_v50, %v300_v49  ;;  %v214_v60 = vadd.f32 %v1565_v5, %v213_v51  ;;  %v306_v8 = vmax.f32 %v222_v3, 0.0  ;;  %v1292_v48 = vpop.f32.mrf.mxu1  ;;  %v316_v49 = vmax.f32 %v262_v46, 0.0 }
  0xe2   :  { %v1277_v55 = vpop.f32.mrf.mxu0  ;;  %v317_v50 = vmax.f32 %v265_v47, 0.0 }
  0xe3   :  { %501 = vmatmul.mubr.bf16.gmra.mxu1 %v326_v40  ;;  %v304_v63 = vmax.f32 %v214_v60, 0.0  ;;  %v225_v4 = vadd.f32 %v1277_v55, %v1565_v5  ;;  %v334_v40 = vpack.c.bf16 %v313_v36, %v312_v35  ;;  %v277_v51 = vpop.f32.mrf.mxu1 }
  0xe4   :  { %510 = vmatprep.mubr.bf16.mxu1 %v1364_v2  ;;  %v216_v58 = vpop.f32.mrf.mxu0  ;;  %v278_v60 = vadd.f32 %v1565_v5, %v277_v51 }
  0xe5   :  { %v217_v61 = vadd.f32 %v1565_v5, %v216_v58  ;;  %v307_v9 = vmax.f32 %v225_v4, 0.0  ;;  %v1293_v55 = vpop.f32.mrf.mxu1 }
  0xe6   :  { %v320_v62 = vmax.f32 %v278_v60, 0.0  ;;  %v289_v1 = vadd.f32 %v1293_v55, %v1565_v5 }
  0xe7   :  { %v305_v0 = vmax.f32 %v217_v61, 0.0  ;;  %v331_v11 = vpack.c.bf16 %v307_v9, %v306_v8  ;;  %v280_v58 = vpop.f32.mrf.mxu1  ;;  %v358_v8 = vlaneseq }
  0xe8   :  { %v281_v61 = vadd.f32 %v1565_v5, %v280_v58 }
  0xe9   :  { %v330_v6 = vpack.c.bf16 %v305_v0, %v304_v63  ;;  %v286_v0 = vadd.f32 %v1292_v48, %v1565_v5  ;;  %v359_v9 = vshrl.u32 %v358_v8, 7 }
  0xea   :  { %v321_v63 = vmax.f32 %v281_v61, 0.0 }
  0xeb   :  { %511 = vmatmul.mubr.bf16.gmra.mxu1 %v327_v45  ;;  %v335_v45 = vpack.c.bf16 %v315_v43, %v314_v42  ;;  %v322_v4 = vmax.f32 %v286_v0, 0.0  ;;  %v364_v10 = vsub.s32 1, %v359_v9 }
  0xec   :  { %520 = vmatprep.mubr.bf16.mxu1 %v1364_v2  ;;  %v338_v3 = vpack.c.bf16 %v321_v63, %v320_v62 }
  0xed   :  { %v1665_v14 = vrot.slane %v356_v12, %v364_v10 }
  0xf3   :  { %521 = vmatmul.mubr.bf16.gmra.mxu1 %v328_v54  ;;  %v336_v54 = vpack.c.bf16 %v317_v50, %v316_v49 }
  0xf4   :  { %530 = vmatprep.mubr.bf16.mxu1 %v1364_v2 }
  0xfb   :  { %531 = vmatmul.mubr.bf16.gmra.mxu1 %v329_v59  ;;  %v337_v59 = vpack.c.bf16 %v319_v57, %v318_v56 }
  0xfc   :  { %540 = vmatprep.mubr.bf16.mxu1 %v1364_v2 }
 0x103   :  { %541 = vmatmul.mubr.bf16.gmra.mxu1 %v330_v6  ;;  %v323_v6 = vmax.f32 %v289_v1, 0.0 }
 0x104   :  { %550 = vmatprep.mubr.bf16.mxu1 %v1364_v2 }
 0x105   :  { %v339_v7 = vpack.c.bf16 %v323_v6, %v322_v4 }
 0x10b   :  { %551 = vmatmul.mubr.bf16.gmra.mxu1 %v331_v11  ;;  %v360_v11 = vsub.s32 0, %v359_v9 }
 0x10c   :  { %560 = vmatprep.mubr.bf16.mxu1 %v1364_v2 }
 0x10d   :  { %v1667_v5 = vrot.slane %v356_v12, %v360_v11 }
 0x113   :  { %561 = vmatmul.mubr.bf16.gmra.mxu1 %v332_v20 }
 0x114   :  { %570 = vmatprep.mubr.bf16.mxu1 %v1364_v2 }
 0x11b   :  { %571 = vmatmul.mubr.bf16.gmra.mxu1 %v333_v29 }
 0x11c   :  { %580 = vmatprep.mubr.bf16.mxu1 %v1364_v2 }
 0x123   :  { %581 = vmatmul.mubr.bf16.gmra.mxu1 %v334_v40 }
 0x124   :  { %590 = vmatprep.mubr.bf16.mxu1 %v1364_v2 }
 0x12b   :  { %591 = vmatmul.mubr.bf16.gmra.mxu1 %v335_v45 }
 0x12c   :  { %600 = vmatprep.mubr.bf16.mxu1 %v1364_v2 }
 0x133   :  { %601 = vmatmul.mubr.bf16.gmra.mxu1 %v336_v54 }
 0x134   :  { %610 = vmatprep.mubr.bf16.mxu1 %v1364_v2 }
 0x13b   :  { %611 = vmatmul.mubr.bf16.gmra.mxu1 %v337_v59 }
 0x13c   :  { %620 = vmatprep.mubr.bf16.mxu1 %v1364_v2 }
 0x143   :  { %621 = vmatmul.mubr.bf16.gmra.mxu1 %v338_v3 }
 0x144   :  { %630 = vmatprep.mubr.bf16.mxu1 %v1364_v2 }
 0x14b   :  { %631 = vmatmul.mubr.bf16.gmra.mxu1 %v339_v7 }
 0x193   :  { %v482_v13 = vpop.f32.mrf.mxu1 }
 0x194   :  { %v483_v18 = vadd.f32 %v482_v13, %v1667_v5 }
 0x195   :  { %v484_v15 = vpop.f32.mrf.mxu1 }
 0x196   :  { %v485_v2 = vadd.f32 %v484_v15, %v1665_v14  ;;  %v641_v25 = vmax.f32 %v483_v18, 0.0 }
 0x197   :  { %v486_v16 = vpop.f32.mrf.mxu1 }
 0x198   :  { %v487_v17 = vadd.f32 %v486_v16, %v1667_v5  ;;  %v642_v23 = vmax.f32 %v485_v2, 0.0 }
 0x199   :  { %v488_v19 = vpop.f32.mrf.mxu1 }
 0x19a   :  { %v489_v20 = vadd.f32 %v488_v19, %v1665_v14  ;;  %v643_v21 = vmax.f32 %v487_v17, 0.0 }
 0x19b   :  { %v492_v22 = vpop.f32.mrf.mxu1 }
 0x19c   :  { %v644_v24 = vmax.f32 %v489_v20, 0.0  ;;  %v705_v28 = vpack.c.bf16 %v643_v21, %v641_v25  ;;  %v493_v32 = vadd.f32 %v492_v22, %v1667_v5 }
 0x19d   :  { %v494_v26 = vpop.f32.mrf.mxu1 }
 0x19e   :  { %v706_v27 = vpack.c.bf16 %v644_v24, %v642_v23  ;;  %v495_v30 = vadd.f32 %v494_v26, %v1665_v14  ;;  %v645_v39 = vmax.f32 %v493_v32, 0.0 }
 0x19f   :  { %v496_v29 = vpop.f32.mrf.mxu1 }
 0x1a0   :  { %v497_v31 = vadd.f32 %v496_v29, %v1667_v5  ;;  %904 = vmatprep.mubr.bf16.mxu0 %v706_v27  ;;  %v646_v37 = vmax.f32 %v495_v30, 0.0 }
 0x1a1   :  { %v498_v33 = vpop.f32.mrf.mxu1  ;;  %905 = vmatmul.mubr.bf16.vlgmr.msra.gmra.mxu0 %v705_v28 }
 0x1a2   :  { %v499_v34 = vadd.f32 %v498_v33, %v1665_v14  ;;  %v647_v35 = vmax.f32 %v497_v31, 0.0 }
 0x1a3   :  { %v502_v36 = vpop.f32.mrf.mxu1 }
 0x1a4   :  { %v648_v38 = vmax.f32 %v499_v34, 0.0  ;;  %v707_v42 = vpack.c.bf16 %v647_v35, %v645_v39  ;;  %v503_v46 = vadd.f32 %v502_v36, %v1667_v5 }
 0x1a5   :  { %v504_v40 = vpop.f32.mrf.mxu1 }
 0x1a6   :  { %v708_v41 = vpack.c.bf16 %v648_v38, %v646_v37  ;;  %v505_v44 = vadd.f32 %v504_v40, %v1665_v14  ;;  %v649_v53 = vmax.f32 %v503_v46, 0.0 }
 0x1a7   :  { %v506_v43 = vpop.f32.mrf.mxu1 }
 0x1a8   :  { %v507_v45 = vadd.f32 %v506_v43, %v1667_v5  ;;  %912 = vmatprep.mubr.bf16.mxu0 %v708_v41  ;;  %v650_v51 = vmax.f32 %v505_v44, 0.0 }
 0x1a9   :  { %v508_v47 = vpop.f32.mrf.mxu1  ;;  %913 = vmatmul.mubr.bf16.gmra.mxu0 %v707_v42 }
 0x1aa   :  { %v509_v48 = vadd.f32 %v508_v47, %v1665_v14  ;;  %v651_v49 = vmax.f32 %v507_v45, 0.0 }
 0x1ab   :  { %v512_v50 = vpop.f32.mrf.mxu1 }
 0x1ac   :  { %v652_v52 = vmax.f32 %v509_v48, 0.0  ;;  %v709_v56 = vpack.c.bf16 %v651_v49, %v649_v53  ;;  %v513_v60 = vadd.f32 %v512_v50, %v1667_v5 }
 0x1ad   :  { %v514_v54 = vpop.f32.mrf.mxu1 }
 0x1ae   :  { %v710_v55 = vpack.c.bf16 %v652_v52, %v650_v51  ;;  %v515_v58 = vadd.f32 %v514_v54, %v1665_v14  ;;  %v653_v4 = vmax.f32 %v513_v60, 0.0 }
 0x1af   :  { %v516_v57 = vpop.f32.mrf.mxu1 }
 0x1b0   :  { %v517_v59 = vadd.f32 %v516_v57, %v1667_v5  ;;  %920 = vmatprep.mubr.bf16.mxu0 %v710_v55  ;;  %v654_v1 = vmax.f32 %v515_v58, 0.0 }
 0x1b1   :  { %v518_v61 = vpop.f32.mrf.mxu1  ;;  %921 = vmatmul.mubr.bf16.gmra.mxu0 %v709_v56 }
 0x1b2   :  { %v519_v62 = vadd.f32 %v518_v61, %v1665_v14  ;;  %v655_v63 = vmax.f32 %v517_v59, 0.0 }
 0x1b3   :  { %v522_v0 = vpop.f32.mrf.mxu1 }
 0x1b4   :  { %v656_v3 = vmax.f32 %v519_v62, 0.0  ;;  %v711_v8 = vpack.c.bf16 %v655_v63, %v653_v4  ;;  %v523_v12 = vadd.f32 %v522_v0, %v1667_v5 }
 0x1b5   :  { %v524_v6 = vpop.f32.mrf.mxu1 }
 0x1b6   :  { %v712_v7 = vpack.c.bf16 %v656_v3, %v654_v1  ;;  %v525_v10 = vadd.f32 %v524_v6, %v1665_v14  ;;  %v657_v19 = vmax.f32 %v523_v12, 0.0 }
 0x1b7   :  { %v526_v9 = vpop.f32.mrf.mxu1 }
 0x1b8   :  { %v527_v11 = vadd.f32 %v526_v9, %v1667_v5  ;;  %928 = vmatprep.mubr.bf16.mxu0 %v712_v7  ;;  %v658_v17 = vmax.f32 %v525_v10, 0.0 }
 0x1b9   :  { %v528_v13 = vpop.f32.mrf.mxu1  ;;  %929 = vmatmul.mubr.bf16.gmra.mxu0 %v711_v8 }
 0x1ba   :  { %v529_v15 = vadd.f32 %v528_v13, %v1665_v14  ;;  %v659_v16 = vmax.f32 %v527_v11, 0.0 }
 0x1bb   :  { %v532_v2 = vpop.f32.mrf.mxu1 }
 0x1bc   :  { %v660_v18 = vmax.f32 %v529_v15, 0.0  ;;  %v713_v22 = vpack.c.bf16 %v659_v16, %v657_v19  ;;  %v533_v26 = vadd.f32 %v532_v2, %v1667_v5 }
 0x1bd   :  { %v534_v20 = vpop.f32.mrf.mxu1 }
 0x1be   :  { %v714_v21 = vpack.c.bf16 %v660_v18, %v658_v17  ;;  %v535_v24 = vadd.f32 %v534_v20, %v1665_v14  ;;  %v661_v33 = vmax.f32 %v533_v26, 0.0 }
 0x1bf   :  { %v536_v23 = vpop.f32.mrf.mxu1 }
 0x1c0   :  { %v537_v25 = vadd.f32 %v536_v23, %v1667_v5  ;;  %936 = vmatprep.mubr.bf16.mxu0 %v714_v21  ;;  %v662_v31 = vmax.f32 %v535_v24, 0.0 }
 0x1c1   :  { %v538_v27 = vpop.f32.mrf.mxu1  ;;  %937 = vmatmul.mubr.bf16.gmra.mxu0 %v713_v22 }
 0x1c2   :  { %v539_v28 = vadd.f32 %v538_v27, %v1665_v14  ;;  %v663_v29 = vmax.f32 %v537_v25, 0.0 }
 0x1c3   :  { %v542_v30 = vpop.f32.mrf.mxu1 }
 0x1c4   :  { %v664_v32 = vmax.f32 %v539_v28, 0.0  ;;  %v715_v36 = vpack.c.bf16 %v663_v29, %v661_v33  ;;  %v543_v40 = vadd.f32 %v542_v30, %v1667_v5 }
 0x1c5   :  { %v544_v34 = vpop.f32.mrf.mxu1 }
 0x1c6   :  { %v716_v35 = vpack.c.bf16 %v664_v32, %v662_v31  ;;  %v545_v38 = vadd.f32 %v544_v34, %v1665_v14  ;;  %v665_v47 = vmax.f32 %v543_v40, 0.0 }
 0x1c7   :  { %v546_v37 = vpop.f32.mrf.mxu1 }
 0x1c8   :  { %v547_v39 = vadd.f32 %v546_v37, %v1667_v5  ;;  %944 = vmatprep.mubr.bf16.mxu0 %v716_v35  ;;  %v666_v45 = vmax.f32 %v545_v38, 0.0 }
 0x1c9   :  { %v548_v41 = vpop.f32.mrf.mxu1  ;;  %945 = vmatmul.mubr.bf16.gmra.mxu0 %v715_v36 }
 0x1ca   :  { %v549_v42 = vadd.f32 %v548_v41, %v1665_v14  ;;  %v667_v43 = vmax.f32 %v547_v39, 0.0 }
 0x1cb   :  { %v552_v44 = vpop.f32.mrf.mxu1 }
 0x1cc   :  { %v668_v46 = vmax.f32 %v549_v42, 0.0  ;;  %v717_v50 = vpack.c.bf16 %v667_v43, %v665_v47  ;;  %v553_v54 = vadd.f32 %v552_v44, %v1667_v5 }
 0x1cd   :  { %v554_v48 = vpop.f32.mrf.mxu1 }
 0x1ce   :  { %v718_v49 = vpack.c.bf16 %v668_v46, %v666_v45  ;;  %v555_v52 = vadd.f32 %v554_v48, %v1665_v14  ;;  %v669_v61 = vmax.f32 %v553_v54, 0.0 }
 0x1cf   :  { %v556_v51 = vpop.f32.mrf.mxu1 }
 0x1d0   :  { %v557_v53 = vadd.f32 %v556_v51, %v1667_v5  ;;  %952 = vmatprep.mubr.bf16.mxu0 %v718_v49  ;;  %v670_v59 = vmax.f32 %v555_v52, 0.0 }
 0x1d1   :  { %v558_v55 = vpop.f32.mrf.mxu1  ;;  %953 = vmatmul.mubr.bf16.gmra.mxu0 %v717_v50 }
 0x1d2   :  { %v559_v56 = vadd.f32 %v558_v55, %v1665_v14  ;;  %v671_v57 = vmax.f32 %v557_v53, 0.0 }
 0x1d3   :  { %v562_v58 = vpop.f32.mrf.mxu1 }
 0x1d4   :  { %v672_v60 = vmax.f32 %v559_v56, 0.0  ;;  %v719_v0 = vpack.c.bf16 %v671_v57, %v669_v61  ;;  %v563_v6 = vadd.f32 %v562_v58, %v1667_v5 }
 0x1d5   :  { %v564_v62 = vpop.f32.mrf.mxu1 }
 0x1d6   :  { %v720_v63 = vpack.c.bf16 %v672_v60, %v670_v59  ;;  %v565_v3 = vadd.f32 %v564_v62, %v1665_v14  ;;  %v673_v13 = vmax.f32 %v563_v6, 0.0 }
 0x1d7   :  { %v566_v1 = vpop.f32.mrf.mxu1 }
 0x1d8   :  { %v567_v4 = vadd.f32 %v566_v1, %v1667_v5  ;;  %960 = vmatprep.mubr.bf16.mxu0 %v720_v63  ;;  %v674_v11 = vmax.f32 %v565_v3, 0.0 }
 0x1d9   :  { %v568_v7 = vpop.f32.mrf.mxu1  ;;  %961 = vmatmul.mubr.bf16.gmra.mxu0 %v719_v0 }
 0x1da   :  { %v569_v8 = vadd.f32 %v568_v7, %v1665_v14  ;;  %v675_v9 = vmax.f32 %v567_v4, 0.0 }
 0x1db   :  { %v572_v10 = vpop.f32.mrf.mxu1 }
 0x1dc   :  { %v676_v12 = vmax.f32 %v569_v8, 0.0  ;;  %v721_v2 = vpack.c.bf16 %v675_v9, %v673_v13  ;;  %v573_v20 = vadd.f32 %v572_v10, %v1667_v5 }
 0x1dd   :  { %v574_v15 = vpop.f32.mrf.mxu1 }
 0x1de   :  { %v722_v16 = vpack.c.bf16 %v676_v12, %v674_v11  ;;  %v575_v18 = vadd.f32 %v574_v15, %v1665_v14  ;;  %v677_v27 = vmax.f32 %v573_v20, 0.0 }
 0x1df   :  { %v576_v17 = vpop.f32.mrf.mxu1 }
 0x1e0   :  { %v577_v19 = vadd.f32 %v576_v17, %v1667_v5  ;;  %968 = vmatprep.mubr.bf16.mxu0 %v722_v16  ;;  %v678_v25 = vmax.f32 %v575_v18, 0.0 }
 0x1e1   :  { %v578_v21 = vpop.f32.mrf.mxu1  ;;  %969 = vmatmul.mubr.bf16.gmra.mxu0 %v721_v2 }
 0x1e2   :  { %v579_v22 = vadd.f32 %v578_v21, %v1665_v14  ;;  %v679_v23 = vmax.f32 %v577_v19, 0.0 }
 0x1e3   :  { %v582_v24 = vpop.f32.mrf.mxu1 }
 0x1e4   :  { %v680_v26 = vmax.f32 %v579_v22, 0.0  ;;  %v723_v30 = vpack.c.bf16 %v679_v23, %v677_v27  ;;  %v583_v34 = vadd.f32 %v582_v24, %v1667_v5 }
 0x1e5   :  { %v584_v28 = vpop.f32.mrf.mxu1 }
 0x1e6   :  { %v724_v29 = vpack.c.bf16 %v680_v26, %v678_v25  ;;  %v585_v32 = vadd.f32 %v584_v28, %v1665_v14  ;;  %v681_v41 = vmax.f32 %v583_v34, 0.0 }
 0x1e7   :  { %v586_v31 = vpop.f32.mrf.mxu1 }
 0x1e8   :  { %v587_v33 = vadd.f32 %v586_v31, %v1667_v5  ;;  %976 = vmatprep.mubr.bf16.mxu0 %v724_v29  ;;  %v682_v39 = vmax.f32 %v585_v32, 0.0 }
 0x1e9   :  { %v588_v35 = vpop.f32.mrf.mxu1  ;;  %977 = vmatmul.mubr.bf16.gmra.mxu0 %v723_v30 }
 0x1ea   :  { %v589_v36 = vadd.f32 %v588_v35, %v1665_v14  ;;  %v683_v37 = vmax.f32 %v587_v33, 0.0 }
 0x1eb   :  { %v592_v38 = vpop.f32.mrf.mxu1 }
 0x1ec   :  { %v684_v40 = vmax.f32 %v589_v36, 0.0  ;;  %v725_v44 = vpack.c.bf16 %v683_v37, %v681_v41  ;;  %v593_v48 = vadd.f32 %v592_v38, %v1667_v5 }
 0x1ed   :  { %v594_v42 = vpop.f32.mrf.mxu1 }
 0x1ee   :  { %v726_v43 = vpack.c.bf16 %v684_v40, %v682_v39  ;;  %v595_v46 = vadd.f32 %v594_v42, %v1665_v14  ;;  %v685_v55 = vmax.f32 %v593_v48, 0.0 }
 0x1ef   :  { %v596_v45 = vpop.f32.mrf.mxu1 }
 0x1f0   :  { %v597_v47 = vadd.f32 %v596_v45, %v1667_v5  ;;  %984 = vmatprep.mubr.bf16.mxu0 %v726_v43  ;;  %v686_v53 = vmax.f32 %v595_v46, 0.0 }
 0x1f1   :  { %v598_v49 = vpop.f32.mrf.mxu1  ;;  %985 = vmatmul.mubr.bf16.gmra.mxu0 %v725_v44 }
 0x1f2   :  { %v599_v50 = vadd.f32 %v598_v49, %v1665_v14  ;;  %v687_v51 = vmax.f32 %v597_v47, 0.0 }
 0x1f3   :  { %v602_v52 = vpop.f32.mrf.mxu1 }
 0x1f4   :  { %v688_v54 = vmax.f32 %v599_v50, 0.0  ;;  %v727_v58 = vpack.c.bf16 %v687_v51, %v685_v55  ;;  %v603_v62 = vadd.f32 %v602_v52, %v1667_v5  ;;  %v1736_v52 = vld [vmem:[%s1777_s4 + $0x3] ss:$0 sm:$0xff]  ;;  %s1365_s4 = smov [#allocation2]  }
 0x1f5   :  { %v604_v56 = vpop.f32.mrf.mxu1  ;;  %s1070_s19 = sshll.u32 %s1365_s4, 4  ;;  %s1071_s19 = int_to_ptr.vmem [resolvable:$true] %s1070_s19 }
 0x1f6   :  { %v728_v57 = vpack.c.bf16 %v688_v54, %v686_v53  ;;  %v605_v60 = vadd.f32 %v604_v56, %v1665_v14  ;;  %v689_v7 = vmax.f32 %v603_v62, 0.0  ;;  %s1342_s20 = scalar_lea.vmem %s1071_s19, 4096  ;;  %p1347_p1 = scmp.lt.s32.totalorder %s1071_s19, %s1071_s19 }
 0x1f7   :  { %v606_v59 = vpop.f32.mrf.mxu1  ;;  %p1343_p0 = scmp.ne.s32.totalorder %s1071_s19, %s1342_s20  ;;  %p1348_p2 = scmp.lt.s32.totalorder %s1342_s20, %s1342_s20 }
 0x1f8   :  { %v607_v61 = vadd.f32 %v606_v59, %v1667_v5  ;;  %992 = vmatprep.mubr.bf16.mxu0 %v728_v57  ;;  %v690_v4 = vmax.f32 %v605_v60, 0.0 }
 0x1f9   :  { %v608_v63 = vpop.f32.mrf.mxu1  ;;  %993 = vmatmul.mubr.bf16.gmra.mxu0 %v727_v58  ;;  %p1349_p3 = por %p1348_p2, %p1347_p1 }
 0x1fa   :  { %v609_v0 = vadd.f32 %v608_v63, %v1665_v14  ;;  %v691_v1 = vmax.f32 %v607_v61, 0.0 }
 0x1fb   :  { %v612_v3 = vpop.f32.mrf.mxu1  ;;  %p1350_p4 = pnand %p1349_p3, %p1343_p0 }
 0x1fc   :  { %v692_v6 = vmax.f32 %v609_v0, 0.0  ;;  %v729_v10 = vpack.c.bf16 %v691_v1, %v689_v7  ;;  %v613_v15 = vadd.f32 %v612_v3, %v1667_v5 }
 0x1fd   :  { %v614_v8 = vpop.f32.mrf.mxu1 }
 0x1fe   :  { %v730_v9 = vpack.c.bf16 %v692_v6, %v690_v4  ;;  %v615_v12 = vadd.f32 %v614_v8, %v1665_v14  ;;  %v693_v21 = vmax.f32 %v613_v15, 0.0 }
 0x1ff   :  { %v616_v11 = vpop.f32.mrf.mxu1 }
 0x200   :  { %v617_v13 = vadd.f32 %v616_v11, %v1667_v5  ;;  %1000 = vmatprep.mubr.bf16.mxu0 %v730_v9  ;;  %v694_v19 = vmax.f32 %v615_v12, 0.0 }
 0x201   :  { %v618_v16 = vpop.f32.mrf.mxu1  ;;  %1001 = vmatmul.mubr.bf16.gmra.mxu0 %v729_v10 }
 0x202   :  { %v619_v2 = vadd.f32 %v618_v16, %v1665_v14  ;;  %v695_v17 = vmax.f32 %v617_v13, 0.0 }
 0x203   :  { %v622_v18 = vpop.f32.mrf.mxu1 }
 0x204   :  { %v696_v20 = vmax.f32 %v619_v2, 0.0  ;;  %v731_v24 = vpack.c.bf16 %v695_v17, %v693_v21  ;;  %v623_v28 = vadd.f32 %v622_v18, %v1667_v5 }
 0x205   :  { %v624_v22 = vpop.f32.mrf.mxu1 }
 0x206   :  { %v732_v23 = vpack.c.bf16 %v696_v20, %v694_v19  ;;  %v625_v26 = vadd.f32 %v624_v22, %v1665_v14  ;;  %v697_v35 = vmax.f32 %v623_v28, 0.0 }
 0x207   :  { %v626_v25 = vpop.f32.mrf.mxu1 }
 0x208   :  { %v627_v27 = vadd.f32 %v626_v25, %v1667_v5  ;;  %1008 = vmatprep.mubr.bf16.mxu0 %v732_v23  ;;  %v698_v33 = vmax.f32 %v625_v26, 0.0 }
 0x209   :  { %v628_v29 = vpop.f32.mrf.mxu1  ;;  %1009 = vmatmul.mubr.bf16.gmra.mxu0 %v731_v24 }
 0x20a   :  { %v629_v30 = vadd.f32 %v628_v29, %v1665_v14  ;;  %v699_v31 = vmax.f32 %v627_v27, 0.0 }
 0x20b   :  { %v632_v32 = vpop.f32.mrf.mxu1 }
 0x20c   :  { %v700_v34 = vmax.f32 %v629_v30, 0.0  ;;  %v733_v38 = vpack.c.bf16 %v699_v31, %v697_v35  ;;  %v633_v42 = vadd.f32 %v632_v32, %v1667_v5 }
 0x20d   :  { %v634_v36 = vpop.f32.mrf.mxu1 }
 0x20e   :  { %v734_v37 = vpack.c.bf16 %v700_v34, %v698_v33  ;;  %v635_v40 = vadd.f32 %v634_v36, %v1665_v14  ;;  %v701_v48 = vmax.f32 %v633_v42, 0.0 }
 0x20f   :  { %v636_v39 = vpop.f32.mrf.mxu1 }
 0x210   :  { %v637_v41 = vadd.f32 %v636_v39, %v1667_v5  ;;  %1016 = vmatprep.mubr.bf16.mxu0 %v734_v37  ;;  %v702_v46 = vmax.f32 %v635_v40, 0.0 }
 0x211   :  { %v638_v43 = vpop.f32.mrf.mxu1  ;;  %1017 = vmatmul.mubr.bf16.gmra.mxu0 %v733_v38 }
 0x212   :  { %v639_v44 = vadd.f32 %v638_v43, %v1665_v14  ;;  %v703_v45 = vmax.f32 %v637_v41, 0.0 }
 0x214   :  { %v704_v47 = vmax.f32 %v639_v44, 0.0  ;;  %v735_v50 = vpack.c.bf16 %v703_v45, %v701_v48 }
 0x216   :  { %v736_v49 = vpack.c.bf16 %v704_v47, %v702_v46 }
 0x218   :  { %1024 = vmatprep.mubr.bf16.mxu0 %v736_v49 }
 0x219   :  { %1025 = vmatmul.mubr.bf16.gmra.mxu0 %v735_v50 }
 0x261   :  { %v1164_v51 = vpop.f32.mrf.mxu0 }
 0x263   :  { %v1165_v53 = vpop.f32.mrf.mxu0 }
 0x264   :  { %v1166_v5 = vadd.f32 %v1165_v53, %v1164_v51 }
 0x265   :  { %v1167_v54 = vpop.f32.mrf.mxu0 }
 0x266   :  { %v907_v55 = vadd.f32 %v1166_v5, %v1736_v52 }
 0x267   :  { %v1168_v14 = vpop.f32.mrf.mxu0 }
 0x268   :  { %1033 = vst [vmem:[#allocation2] sm:$0xff] %v907_v55  ;;  %v1169_v56 = vadd.f32 %v1168_v14, %v1167_v54 }
 0x269   :  { %v1170_v57 = vpop.f32.mrf.mxu0 }
 0x26a   :  { %v910_v58 = vadd.f32 %v1169_v56, %v1736_v52 }
 0x26b   :  { %v1171_v59 = vpop.f32.mrf.mxu0 }
 0x26c   :  { %1034 = vst [vmem:[#allocation2 + $0x8] sm:$0xff] %v910_v58  ;;  %v1172_v60 = vadd.f32 %v1171_v59, %v1170_v57 }
 0x26d   :  { %v1173_v61 = vpop.f32.mrf.mxu0 }
 0x26e   :  { %v915_v62 = vadd.f32 %v1172_v60, %v1736_v52 }
 0x26f   :  { %v1174_v63 = vpop.f32.mrf.mxu0 }
 0x270   :  { %1035 = vst [vmem:[#allocation2 + $0x10] sm:$0xff] %v915_v62  ;;  %v1175_v0 = vadd.f32 %v1174_v63, %v1173_v61 }
 0x271   :  { %v1176_v1 = vpop.f32.mrf.mxu0 }
 0x272   :  { %v918_v3 = vadd.f32 %v1175_v0, %v1736_v52 }
 0x273   :  { %v1177_v4 = vpop.f32.mrf.mxu0 }
 0x274   :  { %1036 = vst [vmem:[#allocation2 + $0x18] sm:$0xff] %v918_v3  ;;  %v1178_v6 = vadd.f32 %v1177_v4, %v1176_v1 }
 0x275   :  { %v1179_v7 = vpop.f32.mrf.mxu0 }
 0x276   :  { %v923_v8 = vadd.f32 %v1178_v6, %v1736_v52 }
 0x277   :  { %v1180_v9 = vpop.f32.mrf.mxu0 }
 0x278   :  { %1037 = vst [vmem:[#allocation2 + $0x20] sm:$0xff] %v923_v8  ;;  %v1181_v10 = vadd.f32 %v1180_v9, %v1179_v7 }
 0x279   :  { %v1182_v11 = vpop.f32.mrf.mxu0 }
 0x27a   :  { %v926_v12 = vadd.f32 %v1181_v10, %v1736_v52 }
 0x27b   :  { %v1183_v13 = vpop.f32.mrf.mxu0 }
 0x27c   :  { %1038 = vst [vmem:[#allocation2 + $0x28] sm:$0xff] %v926_v12  ;;  %v1184_v15 = vadd.f32 %v1183_v13, %v1182_v11 }
 0x27d   :  { %v1185_v16 = vpop.f32.mrf.mxu0 }
 0x27e   :  { %v931_v2 = vadd.f32 %v1184_v15, %v1736_v52 }
 0x27f   :  { %v1186_v17 = vpop.f32.mrf.mxu0 }
 0x280   :  { %1039 = vst [vmem:[#allocation2 + $0x30] sm:$0xff] %v931_v2  ;;  %v1187_v18 = vadd.f32 %v1186_v17, %v1185_v16 }
 0x281   :  { %v1188_v19 = vpop.f32.mrf.mxu0 }
 0x282   :  { %v934_v20 = vadd.f32 %v1187_v18, %v1736_v52 }
 0x283   :  { %v1189_v21 = vpop.f32.mrf.mxu0 }
 0x284   :  { %1040 = vst [vmem:[#allocation2 + $0x38] sm:$0xff] %v934_v20  ;;  %v1190_v22 = vadd.f32 %v1189_v21, %v1188_v19 }
 0x285   :  { %v1191_v23 = vpop.f32.mrf.mxu0 }
 0x286   :  { %v939_v24 = vadd.f32 %v1190_v22, %v1736_v52 }
 0x287   :  { %v1192_v25 = vpop.f32.mrf.mxu0 }
 0x288   :  { %1041 = vst [vmem:[#allocation2 + $0x40] sm:$0xff] %v939_v24  ;;  %v1193_v26 = vadd.f32 %v1192_v25, %v1191_v23 }
 0x289   :  { %v1194_v27 = vpop.f32.mrf.mxu0 }
 0x28a   :  { %v942_v28 = vadd.f32 %v1193_v26, %v1736_v52 }
 0x28b   :  { %v1195_v29 = vpop.f32.mrf.mxu0 }
 0x28c   :  { %1042 = vst [vmem:[#allocation2 + $0x48] sm:$0xff] %v942_v28  ;;  %v1196_v30 = vadd.f32 %v1195_v29, %v1194_v27 }
 0x28d   :  { %v1197_v31 = vpop.f32.mrf.mxu0 }
 0x28e   :  { %v947_v32 = vadd.f32 %v1196_v30, %v1736_v52 }
 0x28f   :  { %v1198_v33 = vpop.f32.mrf.mxu0 }
 0x290   :  { %1043 = vst [vmem:[#allocation2 + $0x50] sm:$0xff] %v947_v32  ;;  %v1199_v34 = vadd.f32 %v1198_v33, %v1197_v31 }
 0x291   :  { %v1200_v35 = vpop.f32.mrf.mxu0 }
 0x292   :  { %v950_v36 = vadd.f32 %v1199_v34, %v1736_v52 }
 0x293   :  { %v1201_v37 = vpop.f32.mrf.mxu0 }
 0x294   :  { %1044 = vst [vmem:[#allocation2 + $0x58] sm:$0xff] %v950_v36  ;;  %v1202_v38 = vadd.f32 %v1201_v37, %v1200_v35 }
 0x295   :  { %v1203_v39 = vpop.f32.mrf.mxu0 }
 0x296   :  { %v955_v40 = vadd.f32 %v1202_v38, %v1736_v52 }
 0x297   :  { %v1204_v41 = vpop.f32.mrf.mxu0 }
 0x298   :  { %1045 = vst [vmem:[#allocation2 + $0x60] sm:$0xff] %v955_v40  ;;  %v1205_v42 = vadd.f32 %v1204_v41, %v1203_v39 }
 0x299   :  { %v1206_v43 = vpop.f32.mrf.mxu0 }
 0x29a   :  { %v958_v44 = vadd.f32 %v1205_v42, %v1736_v52 }
 0x29b   :  { %v1207_v45 = vpop.f32.mrf.mxu0 }
 0x29c   :  { %1046 = vst [vmem:[#allocation2 + $0x68] sm:$0xff] %v958_v44  ;;  %v1208_v46 = vadd.f32 %v1207_v45, %v1206_v43 }
 0x29d   :  { %v1209_v47 = vpop.f32.mrf.mxu0 }
 0x29e   :  { %v963_v48 = vadd.f32 %v1208_v46, %v1736_v52 }
 0x29f   :  { %v1210_v49 = vpop.f32.mrf.mxu0 }
 0x2a0   :  { %1047 = vst [vmem:[#allocation2 + $0x70] sm:$0xff] %v963_v48  ;;  %v1211_v50 = vadd.f32 %v1210_v49, %v1209_v47 }
 0x2a1   :  { %v1212_v51 = vpop.f32.mrf.mxu0 }
 0x2a2   :  { %v966_v53 = vadd.f32 %v1211_v50, %v1736_v52 }
 0x2a3   :  { %v1213_v5 = vpop.f32.mrf.mxu0 }
 0x2a4   :  { %1048 = vst [vmem:[#allocation2 + $0x78] sm:$0xff] %v966_v53  ;;  %v1214_v54 = vadd.f32 %v1213_v5, %v1212_v51 }
 0x2a5   :  { %v1215_v55 = vpop.f32.mrf.mxu0 }
 0x2a6   :  { %v971_v14 = vadd.f32 %v1214_v54, %v1736_v52 }
 0x2a7   :  { %v1216_v56 = vpop.f32.mrf.mxu0 }
 0x2a8   :  { %1049 = vst [vmem:[#allocation2 + $0x80] sm:$0xff] %v971_v14  ;;  %v1217_v57 = vadd.f32 %v1216_v56, %v1215_v55 }
 0x2a9   :  { %v1218_v58 = vpop.f32.mrf.mxu0 }
 0x2aa   :  { %v974_v59 = vadd.f32 %v1217_v57, %v1736_v52 }
 0x2ab   :  { %v1219_v60 = vpop.f32.mrf.mxu0 }
 0x2ac   :  { %1050 = vst [vmem:[#allocation2 + $0x88] sm:$0xff] %v974_v59  ;;  %v1220_v61 = vadd.f32 %v1219_v60, %v1218_v58 }
 0x2ad   :  { %v1221_v62 = vpop.f32.mrf.mxu0 }
 0x2ae   :  { %v979_v63 = vadd.f32 %v1220_v61, %v1736_v52 }
 0x2af   :  { %v1222_v0 = vpop.f32.mrf.mxu0 }
 0x2b0   :  { %1051 = vst [vmem:[#allocation2 + $0x90] sm:$0xff] %v979_v63  ;;  %v1223_v1 = vadd.f32 %v1222_v0, %v1221_v62 }
 0x2b1   :  { %v1224_v3 = vpop.f32.mrf.mxu0 }
 0x2b2   :  { %v982_v4 = vadd.f32 %v1223_v1, %v1736_v52 }
 0x2b3   :  { %v1225_v6 = vpop.f32.mrf.mxu0 }
 0x2b4   :  { %1052 = vst [vmem:[#allocation2 + $0x98] sm:$0xff] %v982_v4  ;;  %v1226_v7 = vadd.f32 %v1225_v6, %v1224_v3 }
 0x2b5   :  { %v1227_v8 = vpop.f32.mrf.mxu0 }
 0x2b6   :  { %v987_v9 = vadd.f32 %v1226_v7, %v1736_v52 }
 0x2b7   :  { %v1228_v10 = vpop.f32.mrf.mxu0 }
 0x2b8   :  { %1053 = vst [vmem:[#allocation2 + $0xa0] sm:$0xff] %v987_v9  ;;  %v1229_v11 = vadd.f32 %v1228_v10, %v1227_v8 }
 0x2b9   :  { %v1230_v12 = vpop.f32.mrf.mxu0 }
 0x2ba   :  { %v990_v13 = vadd.f32 %v1229_v11, %v1736_v52 }
 0x2bb   :  { %v1231_v15 = vpop.f32.mrf.mxu0 }
 0x2bc   :  { %1054 = vst [vmem:[#allocation2 + $0xa8] sm:$0xff] %v990_v13  ;;  %v1232_v16 = vadd.f32 %v1231_v15, %v1230_v12 }
 0x2bd   :  { %v1233_v2 = vpop.f32.mrf.mxu0 }
 0x2be   :  { %v995_v17 = vadd.f32 %v1232_v16, %v1736_v52 }
 0x2bf   :  { %v1234_v18 = vpop.f32.mrf.mxu0 }
 0x2c0   :  { %1055 = vst [vmem:[#allocation2 + $0xb0] sm:$0xff] %v995_v17  ;;  %v1235_v19 = vadd.f32 %v1234_v18, %v1233_v2 }
 0x2c1   :  { %v1236_v20 = vpop.f32.mrf.mxu0 }
 0x2c2   :  { %v998_v21 = vadd.f32 %v1235_v19, %v1736_v52 }
 0x2c3   :  { %v1237_v22 = vpop.f32.mrf.mxu0 }
 0x2c4   :  { %1056 = vst [vmem:[#allocation2 + $0xb8] sm:$0xff] %v998_v21  ;;  %v1238_v23 = vadd.f32 %v1237_v22, %v1236_v20 }
 0x2c5   :  { %v1239_v24 = vpop.f32.mrf.mxu0 }
 0x2c6   :  { %v1003_v25 = vadd.f32 %v1238_v23, %v1736_v52 }
 0x2c7   :  { %v1240_v26 = vpop.f32.mrf.mxu0 }
 0x2c8   :  { %1057 = vst [vmem:[#allocation2 + $0xc0] sm:$0xff] %v1003_v25  ;;  %v1241_v27 = vadd.f32 %v1240_v26, %v1239_v24 }
 0x2c9   :  { %v1242_v28 = vpop.f32.mrf.mxu0 }
 0x2ca   :  { %v1006_v29 = vadd.f32 %v1241_v27, %v1736_v52 }
 0x2cb   :  { %v1243_v30 = vpop.f32.mrf.mxu0 }
 0x2cc   :  { %1058 = vst [vmem:[#allocation2 + $0xc8] sm:$0xff] %v1006_v29  ;;  %v1244_v31 = vadd.f32 %v1243_v30, %v1242_v28 }
 0x2cd   :  { %v1245_v32 = vpop.f32.mrf.mxu0 }
 0x2ce   :  { %v1011_v33 = vadd.f32 %v1244_v31, %v1736_v52 }
 0x2cf   :  { %v1246_v34 = vpop.f32.mrf.mxu0 }
 0x2d0   :  { %1059 = vst [vmem:[#allocation2 + $0xd0] sm:$0xff] %v1011_v33  ;;  %v1247_v35 = vadd.f32 %v1246_v34, %v1245_v32 }
 0x2d1   :  { %v1248_v36 = vpop.f32.mrf.mxu0 }
 0x2d2   :  { %v1014_v37 = vadd.f32 %v1247_v35, %v1736_v52 }
 0x2d3   :  { %v1249_v38 = vpop.f32.mrf.mxu0 }
 0x2d4   :  { %1060 = vst [vmem:[#allocation2 + $0xd8] sm:$0xff] %v1014_v37  ;;  %v1250_v39 = vadd.f32 %v1249_v38, %v1248_v36 }
 0x2d5   :  { %v1251_v40 = vpop.f32.mrf.mxu0 }
 0x2d6   :  { %v1019_v41 = vadd.f32 %v1250_v39, %v1736_v52 }
 0x2d7   :  { %v1252_v42 = vpop.f32.mrf.mxu0 }
 0x2d8   :  { %1061 = vst [vmem:[#allocation2 + $0xe0] sm:$0xff] %v1019_v41  ;;  %v1253_v43 = vadd.f32 %v1252_v42, %v1251_v40 }
 0x2d9   :  { %v1254_v44 = vpop.f32.mrf.mxu0 }
 0x2da   :  { %v1022_v45 = vadd.f32 %v1253_v43, %v1736_v52 }
 0x2db   :  { %v1255_v46 = vpop.f32.mrf.mxu0 }
 0x2dc   :  { %1062 = vst [vmem:[#allocation2 + $0xe8] sm:$0xff] %v1022_v45  ;;  %v1256_v47 = vadd.f32 %v1255_v46, %v1254_v44 }
 0x2dd   :  { %v1257_v48 = vpop.f32.mrf.mxu0 }
 0x2de   :  { %v1027_v49 = vadd.f32 %v1256_v47, %v1736_v52 }
 0x2df   :  { %v1258_v50 = vpop.f32.mrf.mxu0 }
 0x2e0   :  { %1063 = vst [vmem:[#allocation2 + $0xf0] sm:$0xff] %v1027_v49  ;;  %v1259_v51 = vadd.f32 %v1258_v50, %v1257_v48 }
 0x2e2   :  { %v1030_v53 = vadd.f32 %v1259_v51, %v1736_v52 }
 0x2e4   :  { %1064 = vst [vmem:[#allocation2 + $0xf8] sm:$0xff] %v1030_v53 }
 0x2e5   :  { %1353 = shalt.err (!%p1350_p4)
}
 0x2e6   :  { %s1366_s21 = smov 128   ;;  %s1367_s22 = smov 8  }
 0x2e7   :  { %1076 = dma.vmem_to_hbm [thread:$0]  %s1071_s19, 4096, %s1778_s5, [#allocation3], %s1366_s21, %s1366_s21, %s1367_s22  }
 0x2e8   :  { %1362 = dma.done.wait [#allocation3], 4096  }
 0x2e9   :  { %1363 = vsyncadd [#allocation3], 4294963200 }
 0x2ea   :  { %1080 = vsyncpa [#allocation3], 1 }

</bundles_post_ra>
